<compile_context>
chip_gen: v5e
topology: v5e:2x2
jax: 0.10.0
libtpu: 0.0.40
codegen_flags: <defaults>
</compile_context>

<pallas_src>
import jax
import jax.numpy as jnp
from jax import lax
from jax.experimental import pallas as pl
from jax.experimental.pallas import tpu as pltpu

LANE = 128


def _round_up(x, m):
    return ((x + m - 1) // m) * m


def _cdiv(a, b):
    return (a + b - 1) // b


def _largest_divisor_leq(n, cap):
    cap = max(1, min(n, cap))
    return max(d for d in range(1, cap + 1) if n % d == 0)


def _make_kernel(D_blk, T, W_sub, k, n_c, n_j):
    """Kernel for fixed (static) block geometry.

    x_ref : (G, D_blk*T) bf16/f32 -- D_blk depth slices, T lanes each (flat)
    w0    : (16, G) (x dtype), b0: (16, 1) f32
    w1    : (8, 16) f32,       b1: (8, 1) f32
    w2    : (8, 1)  f32,       b2: (1, 1) f32
    o_ref : (1, T) f32 -- running max over depth; sigmoid applied at d == last
    """
    kT = k * W_sub  # lanes per MXU dot (<= dot_lanes)

    def kernel(x_ref, w0_ref, b0_ref, w1_ref, b1_ref, w2_ref, b2_ref, o_ref):
        d = pl.program_id(3)
        last_d = pl.num_programs(3) - 1

        @pl.when(d == 0)
        def _init():
            o_ref[...] = jnp.full(o_ref.shape, -jnp.inf, dtype=o_ref.dtype)

        w0 = w0_ref[...]
        b0 = b0_ref[...]
        w1 = w1_ref[...]
        b1 = b1_ref[...]
        w2 = w2_ref[...]
        b2 = b2_ref[...]

        def do_chunk(base, o_off):
            xc = x_ref[:, pl.ds(base, kT)]                         # (G, k*W_sub)
            h0 = jnp.maximum(
                jnp.dot(w0, xc, preferred_element_type=jnp.float32) + b0, 0.0)
            h1 = jnp.maximum(
                jnp.dot(w1, h0, preferred_element_type=jnp.float32) + b1, 0.0)
            # final 1x1x1 conv (8 -> 1): VPU multiply + sublane reduce (MXU free)
            z = jnp.sum(w2 * h1, axis=0, keepdims=True) + b2        # (1, k*W_sub)
            # depth running-max by lane-slicing (no sublane relayout)
            zmax = z[:, 0:W_sub]
            for i in range(1, k):
                zmax = jnp.maximum(zmax, z[:, i * W_sub:(i + 1) * W_sub])
            cur = o_ref[:, pl.ds(o_off, W_sub)]
            o_ref[:, pl.ds(o_off, W_sub)] = jnp.maximum(cur, zmax)

        if n_c <= 16:
            # Short, fully static chunk loop: static offsets, best codegen.
            for c in range(n_c):
                do_chunk(c * kT, (c % n_j) * W_sub)
        else:
            # Many chunks: keep the body a loop (bounds vreg live ranges).
            def body(c, carry):
                base = pl.multiple_of(c * kT, LANE)
                if n_j > 1:
                    o_off = pl.multiple_of((c % n_j) * W_sub, LANE)
                else:
                    o_off = 0
                do_chunk(base, o_off)
                return carry
            lax.fori_loop(0, n_c, body, 0)

        @pl.when(d == last_d)
        def _fin():
            o_ref[...] = jax.nn.sigmoid(o_ref[...])

    return kernel


def pixelwise_net(x, params, *, target_block_bytes=2 << 20, dot_lanes=1024,
                  compute_dtype=jnp.bfloat16):
    """x: [B, G, D, H, W] float32 (PyTorch NCDHW). Returns [B, 1, H, W] f32."""
    w0, b0, w1, b1, w2c, b2 = params
    B, G, D, H, W = x.shape
    HW = H * W
    itemsize = jnp.dtype(compute_dtype).itemsize
    dot_lanes = max(LANE, _round_up(dot_lanes, LANE))

    # ---- block geometry ------------------------------------------------------
    HW_pad = _round_up(HW, LANE)
    slice_bytes = G * HW_pad * itemsize            # one depth slice, one batch
    if slice_bytes >= target_block_bytes:
        # Large spatial planes: one depth slice per block, tile spatially.
        # Pad the plane UP to a tile multiple (never shrink the tile to 128).
        D_blk = 1
        t_target = max(dot_lanes,
                       (target_block_bytes // (G * itemsize)) // LANE * LANE)
        n_t = _cdiv(HW_pad, t_target)
        T = _round_up(_cdiv(HW_pad, n_t), dot_lanes)
        HW_pad = n_t * T
    else:
        # Small planes: whole plane per tile; fold depth slices into the lane
        # dim so each block approaches target_block_bytes (big contiguous DMAs).
        T = HW_pad
        n_t = 1
        want = max(1, target_block_bytes // slice_bytes)
        if B == 1 and D >= 2:
            want = min(want, max(1, D // 2))       # keep >= 2 depth blocks (see P)
        D_blk = _largest_divisor_leq(D, want)
    n_d = D // D_blk

    # v7x megacore: if there is only one (batch x spatial-tile) block, split the
    # depth blocks across a size-2 parallel axis. Each half computes its own
    # sigmoid(max); the wrapper combines with one more max (exact, monotone).
    P = 2 if (B * n_t == 1 and n_d >= 2) else 1
    n_d_inner = _cdiv(n_d, P)

    # Compute-chunk geometry: each MXU dot / VPU chain spans <= dot_lanes lanes
    # so h0 (16 x N f32) / h1 stay within the vreg file (v5e spill concern).
    if T <= dot_lanes:
        W_sub = T
        k = _largest_divisor_leq(D_blk, dot_lanes // T)   # depth slices per dot
    else:
        k = 1
        W_sub = max(c for c in range(LANE, dot_lanes + 1, LANE) if T % c == 0)
    n_j = T // W_sub                      # spatial sub-chunks per depth slice
    n_c = (D_blk * T) // (k * W_sub)      # dot chunks per block

    # ---- data prep (free reshape of the natural NCDHW layout) ---------------
    x4 = x.astype(compute_dtype).reshape(B, G, D, HW)
    if HW_pad != HW:
        x4 = jnp.pad(x4, ((0, 0), (0, 0), (0, 0), (0, HW_pad - HW)))
    x_k = x4.reshape(B, G, D * HW_pad)

    w0c = w0.astype(compute_dtype)        # matches x: layer 0 runs the MXU in bf16
    b0c = b0.astype(jnp.float32)
    w1c = w1.astype(jnp.float32)
    b1c = b1.astype(jnp.float32)
    w2f = w2c.astype(jnp.float32)
    b2f = b2.astype(jnp.float32)

    if n_d % P == 0:
        def x_index_map(p, b, t, d):
            return (b, 0, (p * n_d_inner + d) * n_t + t)
    else:
        def x_index_map(p, b, t, d):
            # Clamp: the duplicated last block is a no-op for the running max.
            d_glob = jnp.minimum(p * n_d_inner + d, n_d - 1)
            return (b, 0, d_glob * n_t + t)

    kernel = _make_kernel(D_blk, T, W_sub, k, n_c, n_j)

    out = pl.pallas_call(
        kernel,
        out_shape=jax.ShapeDtypeStruct((P, B, 1, HW_pad), jnp.float32),
        grid_spec=pltpu.PrefetchScalarGridSpec(
            num_scalar_prefetch=0,
            grid=(P, B, n_t, n_d_inner),           # depth blocks = reduction, last
            in_specs=[
                pl.BlockSpec((None, G, D_blk * T), x_index_map),
                pl.BlockSpec((16, G), lambda p, b, t, d: (0, 0)),
                pl.BlockSpec((16, 1), lambda p, b, t, d: (0, 0)),
                pl.BlockSpec((8, 16), lambda p, b, t, d: (0, 0)),
                pl.BlockSpec((8, 1), lambda p, b, t, d: (0, 0)),
                pl.BlockSpec((8, 1), lambda p, b, t, d: (0, 0)),
                pl.BlockSpec((1, 1), lambda p, b, t, d: (0, 0)),
            ],
            out_specs=pl.BlockSpec((None, None, 1, T),
                                   lambda p, b, t, d: (p, b, 0, t)),
        ),
        # ~2 MiB double-buffered x blocks keep total VMEM well under the default
        # scoped limits (16 MiB v5e, 32 MiB v6e/v7x): no vmem override needed.
        compiler_params=pltpu.CompilerParams(
            dimension_semantics=("parallel", "parallel", "parallel", "arbitrary")),
    )(x_k, w0c, b0c, w1c, b1c, w2f, b2f)

    out = jnp.max(out, axis=0)             # combine the parallel depth halves
    return out[:, :, :HW].reshape(B, 1, H, W)


def init_params(key, G):
    """Deterministic synthetic params; BN (eval mode) folded into the 1x1x1 convs."""
    ks = jax.random.split(key, 12)
    eps = 1e-5

    def fold_bn(w, gamma, beta, mean, var):
        scale = gamma / jnp.sqrt(var + eps)
        return w * scale[:, None], (beta - mean * scale)[:, None]

    # conv0: Conv3d(G, 16, 1, bias=False) + BN(16)
    w0 = 0.2 * jax.random.normal(ks[0], (16, G), jnp.float32)
    g0 = 1.0 + 0.1 * jax.random.normal(ks[1], (16,), jnp.float32)
    be0 = 0.1 * jax.random.normal(ks[2], (16,), jnp.float32)
    mu0 = 0.1 * jax.random.normal(ks[3], (16,), jnp.float32)
    v0 = 1.0 + 0.1 * jnp.abs(jax.random.normal(ks[4], (16,), jnp.float32))
    w0e, b0e = fold_bn(w0, g0, be0, mu0, v0)

    # conv1: Conv3d(16, 8, 1, bias=False) + BN(8)
    w1 = 0.2 * jax.random.normal(ks[5], (8, 16), jnp.float32)
    g1 = 1.0 + 0.1 * jax.random.normal(ks[6], (8,), jnp.float32)
    be1 = 0.1 * jax.random.normal(ks[7], (8,), jnp.float32)
    mu1 = 0.1 * jax.random.normal(ks[8], (8,), jnp.float32)
    v1 = 1.0 + 0.1 * jnp.abs(jax.random.normal(ks[9], (8,), jnp.float32))
    w1e, b1e = fold_bn(w1, g1, be1, mu1, v1)

    # conv2: Conv3d(8, 1, 1) with bias; stored as a column (8, 1) for the kernel
    w2 = 0.2 * jax.random.normal(ks[10], (1, 8), jnp.float32)
    b2 = 0.1 * jax.random.normal(ks[11], (1, 1), jnp.float32)

    return (w0e, b0e, w1e, b1e, w2.T, b2)


def reference(x, params, compute_dtype=jnp.bfloat16):
    """Pure-JAX reference of the (BN-folded) PyTorch forward (sigmoid THEN max),
    mirroring the kernel's bf16 quantization of x and the first-layer weights."""
    w0, b0, w1, b1, w2c, b2 = params
    xq = x.astype(compute_dtype).astype(jnp.float32)
    w0q = w0.astype(compute_dtype).astype(jnp.float32)
    h0 = jax.nn.relu(jnp.einsum('bgdhw,og->bodhw', xq, w0q)
                     + b0[:, 0][None, :, None, None, None])
    h1 = jax.nn.relu(jnp.einsum('bgdhw,og->bodhw', h0, w1)
                     + b1[:, 0][None, :, None, None, None])
    z = jnp.einsum('bgdhw,g->bdhw', h1, w2c[:, 0]) + b2[0, 0]   # [B, D, H, W]
    s = jax.nn.sigmoid(z)                        # == squeeze(1) + sigmoid
    return jnp.max(s, axis=1, keepdims=True)     # [B, 1, H, W]


if __name__ == "__main__":
    B, G, D, H, W = 2, 4, 8, 16, 16
    key = jax.random.PRNGKey(0)
    kx, kp = jax.random.split(key)
    x = jax.random.normal(kx, (B, G, D, H, W), jnp.float32)
    params = init_params(kp, G)

    # Main path: B=2 -> depth fully folded into one block per batch (P == 1).
    out = jax.block_until_ready(pixelwise_net(x, params))
    ref = reference(x, params)
    assert out.shape == (B, 1, H, W)
    err = float(jnp.max(jnp.abs(out - ref)))
    assert jnp.allclose(out, ref, atol=1e-4, rtol=1e-4), err

    # B=1 path: exercises the size-2 parallel depth split (v7x megacore).
    out1 = jax.block_until_ready(pixelwise_net(x[:1], params))
    ref1 = reference(x[:1], params)
    assert out1.shape == (1, 1, H, W)
    err1 = float(jnp.max(jnp.abs(out1 - ref1)))
    assert jnp.allclose(out1, ref1, atol=1e-4, rtol=1e-4), err1

    print("KERNEL_OK")
</pallas_src>

<mosaic_0001>
module attributes {stable_mosaic.version = 11 : i64} {
  func.func @kernel(%arg0: i32, %arg1: i32, %arg2: i32, %arg3: i32, %arg4: memref<1x4x2048xbf16, #tpu.memory_space<vmem>>, %arg5: memref<16x4xbf16, #tpu.memory_space<vmem>>, %arg6: memref<16x1xf32, #tpu.memory_space<vmem>>, %arg7: memref<8x16xf32, #tpu.memory_space<vmem>>, %arg8: memref<8x1xf32, #tpu.memory_space<vmem>>, %arg9: memref<8x1xf32, #tpu.memory_space<vmem>>, %arg10: memref<1x1xf32, #tpu.memory_space<vmem>>, %arg11: memref<1x1x1x256xf32, #tpu.memory_space<vmem>>) attributes {dimension_semantics = [#tpu.dimension_semantics<parallel>, #tpu.dimension_semantics<parallel>, #tpu.dimension_semantics<parallel>, #tpu.dimension_semantics<arbitrary>], iteration_bounds = array<i64: 1, 2, 1, 1>, scalar_prefetch = 0 : i64, scratch_operands = 0 : i64, tpu.core_type = #tpu.core_type<tc>, window_params = [{transform_indices = @transform_0, window_bounds = array<i64: 1, 4, 2048>}, {pipeline_mode = #tpu.pipeline_mode<synchronous>, transform_indices = @transform_1, window_bounds = array<i64: 16, 4>}, {pipeline_mode = #tpu.pipeline_mode<synchronous>, transform_indices = @transform_2, window_bounds = array<i64: 16, 1>}, {pipeline_mode = #tpu.pipeline_mode<synchronous>, transform_indices = @transform_3, window_bounds = array<i64: 8, 16>}, {pipeline_mode = #tpu.pipeline_mode<synchronous>, transform_indices = @transform_4, window_bounds = array<i64: 8, 1>}, {pipeline_mode = #tpu.pipeline_mode<synchronous>, transform_indices = @transform_5, window_bounds = array<i64: 8, 1>}, {pipeline_mode = #tpu.pipeline_mode<synchronous>, transform_indices = @transform_6, window_bounds = array<i64: 1, 1>}, {transform_indices = @transform_7, window_bounds = array<i64: 1, 1, 1, 256>}]} {
    %c0_i32 = arith.constant 0 : i32
    %0 = arith.cmpi eq, %arg3, %c0_i32 : i32
    %1 = arith.extui %0 : i1 to i32
    %c0_i32_0 = arith.constant 0 : i32
    %2 = arith.cmpi ne, %1, %c0_i32_0 : i32
    scf.if %2 {
      %cst_44 = arith.constant 0xFF800000 : f32
      %74 = vector.broadcast %cst_44 : f32 to vector<1x256xf32>
      %c0_45 = arith.constant 0 : index
      %c0_46 = arith.constant 0 : index
      %c0_47 = arith.constant 0 : index
      %c0_48 = arith.constant 0 : index
      %75 = vector.load %arg11[%c0_45, %c0_46, %c0_47, %c0_48] : memref<1x1x1x256xf32, #tpu.memory_space<vmem>>, vector<1x1x1x256xf32>
      %76 = vector.shape_cast %75 : vector<1x1x1x256xf32> to vector<1x256xf32>
      %77 = vector.shape_cast %74 : vector<1x256xf32> to vector<1x1x1x256xf32>
      tpu.vector_store %arg11[%c0_45, %c0_46, %c0_47, %c0_48], %77 {strides = array<i32>} : memref<1x1x1x256xf32, #tpu.memory_space<vmem>>, vector<1x1x1x256xf32>,
    } else {
    }
    %c0 = arith.constant 0 : index
    %c0_1 = arith.constant 0 : index
    %3 = vector.load %arg5[%c0, %c0_1] : memref<16x4xbf16, #tpu.memory_space<vmem>>, vector<16x4xbf16>
    %c0_2 = arith.constant 0 : index
    %c0_3 = arith.constant 0 : index
    %4 = vector.load %arg6[%c0_2, %c0_3] : memref<16x1xf32, #tpu.memory_space<vmem>>, vector<16x1xf32>
    %c0_4 = arith.constant 0 : index
    %c0_5 = arith.constant 0 : index
    %5 = vector.load %arg7[%c0_4, %c0_5] : memref<8x16xf32, #tpu.memory_space<vmem>>, vector<8x16xf32>
    %c0_6 = arith.constant 0 : index
    %c0_7 = arith.constant 0 : index
    %6 = vector.load %arg8[%c0_6, %c0_7] : memref<8x1xf32, #tpu.memory_space<vmem>>, vector<8x1xf32>
    %c0_8 = arith.constant 0 : index
    %c0_9 = arith.constant 0 : index
    %7 = vector.load %arg9[%c0_8, %c0_9] : memref<8x1xf32, #tpu.memory_space<vmem>>, vector<8x1xf32>
    %c0_10 = arith.constant 0 : index
    %c0_11 = arith.constant 0 : index
    %8 = vector.load %arg10[%c0_10, %c0_11] : memref<1x1xf32, #tpu.memory_space<vmem>>, vector<1x1xf32>
    %c0_12 = arith.constant 0 : index
    %c0_13 = arith.constant 0 : index
    %c0_14 = arith.constant 0 : index
    %9 = vector.load %arg4[%c0_12, %c0_13, %c0_14] : memref<1x4x2048xbf16, #tpu.memory_space<vmem>>, vector<1x4x1024xbf16>
    %10 = vector.shape_cast %9 : vector<1x4x1024xbf16> to vector<4x1024xbf16>
    %cst = arith.constant dense<0.000000e+00> : vector<16x1024xf32>
    %11 = tpu.matmul %3, %10, %cst {dimension_numbers = #tpu.dot_dimension_numbers<[1], [0], [0], [1], [0, 0, 1, 1], [], []>} : vector<16x4xbf16>, vector<4x1024xbf16>, vector<16x1024xf32> -> vector<16x1024xf32>
    %12 = vector.broadcast %4 : vector<16x1xf32> to vector<16x1024xf32>
    %13 = arith.addf %11, %12 : vector<16x1024xf32>
    %cst_15 = arith.constant 0.000000e+00 : f32
    %14 = vector.broadcast %cst_15 : f32 to vector<16x1024xf32>
    %15 = arith.maximumf %13, %14 : vector<16x1024xf32>
    %cst_16 = arith.constant dense<0.000000e+00> : vector<8x1024xf32>
    %16 = tpu.matmul %5, %15, %cst_16 {dimension_numbers = #tpu.dot_dimension_numbers<[1], [0], [0], [1], [0, 0, 1, 1], [], []>} : vector<8x16xf32>, vector<16x1024xf32>, vector<8x1024xf32> -> vector<8x1024xf32>
    %17 = vector.broadcast %6 : vector<8x1xf32> to vector<8x1024xf32>
    %18 = arith.addf %16, %17 : vector<8x1024xf32>
    %cst_17 = arith.constant 0.000000e+00 : f32
    %19 = vector.broadcast %cst_17 : f32 to vector<8x1024xf32>
    %20 = arith.maximumf %18, %19 : vector<8x1024xf32>
    %21 = vector.broadcast %7 : vector<8x1xf32> to vector<8x1024xf32>
    %22 = arith.mulf %21, %20 : vector<8x1024xf32>
    %cst_18 = arith.constant dense<0.000000e+00> : vector<1024xf32>
    %23 = vector.multi_reduction <add>, %22, %cst_18 [0] : vector<8x1024xf32> to vector<1024xf32>
    %24 = vector.shape_cast %23 : vector<1024xf32> to vector<1x1024xf32>
    %25 = vector.broadcast %8 : vector<1x1xf32> to vector<1x1024xf32>
    %26 = arith.addf %24, %25 : vector<1x1024xf32>
    %27 = vector.extract_strided_slice %26 {offsets = [0, 0], sizes = [1, 256], strides = [1, 1]} : vector<1x1024xf32> to vector<1x256xf32>
    %28 = vector.extract_strided_slice %26 {offsets = [0, 256], sizes = [1, 256], strides = [1, 1]} : vector<1x1024xf32> to vector<1x256xf32>
    %29 = arith.maximumf %27, %28 : vector<1x256xf32>
    %30 = vector.extract_strided_slice %26 {offsets = [0, 512], sizes = [1, 256], strides = [1, 1]} : vector<1x1024xf32> to vector<1x256xf32>
    %31 = arith.maximumf %29, %30 : vector<1x256xf32>
    %32 = vector.extract_strided_slice %26 {offsets = [0, 768], sizes = [1, 256], strides = [1, 1]} : vector<1x1024xf32> to vector<1x256xf32>
    %33 = arith.maximumf %31, %32 : vector<1x256xf32>
    %c0_19 = arith.constant 0 : index
    %c0_20 = arith.constant 0 : index
    %c0_21 = arith.constant 0 : index
    %c0_22 = arith.constant 0 : index
    %34 = vector.load %arg11[%c0_19, %c0_20, %c0_21, %c0_22] : memref<1x1x1x256xf32, #tpu.memory_space<vmem>>, vector<1x1x1x256xf32>
    %35 = vector.shape_cast %34 : vector<1x1x1x256xf32> to vector<1x256xf32>
    %36 = arith.maximumf %35, %33 : vector<1x256xf32>
    %c0_23 = arith.constant 0 : index
    %c0_24 = arith.constant 0 : index
    %c0_25 = arith.constant 0 : index
    %c0_26 = arith.constant 0 : index
    %37 = vector.load %arg11[%c0_23, %c0_24, %c0_25, %c0_26] : memref<1x1x1x256xf32, #tpu.memory_space<vmem>>, vector<1x1x1x256xf32>
    %38 = vector.shape_cast %37 : vector<1x1x1x256xf32> to vector<1x256xf32>
    %39 = vector.shape_cast %36 : vector<1x256xf32> to vector<1x1x1x256xf32>
    tpu.vector_store %arg11[%c0_23, %c0_24, %c0_25, %c0_26], %39 {strides = array<i32>} : memref<1x1x1x256xf32, #tpu.memory_space<vmem>>, vector<1x1x1x256xf32>,
    %c0_27 = arith.constant 0 : index
    %c0_28 = arith.constant 0 : index
    %c1024 = arith.constant 1024 : index
    %40 = vector.load %arg4[%c0_27, %c0_28, %c1024] : memref<1x4x2048xbf16, #tpu.memory_space<vmem>>, vector<1x4x1024xbf16>
    %41 = vector.shape_cast %40 : vector<1x4x1024xbf16> to vector<4x1024xbf16>
    %cst_29 = arith.constant dense<0.000000e+00> : vector<16x1024xf32>
    %42 = tpu.matmul %3, %41, %cst_29 {dimension_numbers = #tpu.dot_dimension_numbers<[1], [0], [0], [1], [0, 0, 1, 1], [], []>} : vector<16x4xbf16>, vector<4x1024xbf16>, vector<16x1024xf32> -> vector<16x1024xf32>
    %43 = vector.broadcast %4 : vector<16x1xf32> to vector<16x1024xf32>
    %44 = arith.addf %42, %43 : vector<16x1024xf32>
    %cst_30 = arith.constant 0.000000e+00 : f32
    %45 = vector.broadcast %cst_30 : f32 to vector<16x1024xf32>
    %46 = arith.maximumf %44, %45 : vector<16x1024xf32>
    %cst_31 = arith.constant dense<0.000000e+00> : vector<8x1024xf32>
    %47 = tpu.matmul %5, %46, %cst_31 {dimension_numbers = #tpu.dot_dimension_numbers<[1], [0], [0], [1], [0, 0, 1, 1], [], []>} : vector<8x16xf32>, vector<16x1024xf32>, vector<8x1024xf32> -> vector<8x1024xf32>
    %48 = vector.broadcast %6 : vector<8x1xf32> to vector<8x1024xf32>
    %49 = arith.addf %47, %48 : vector<8x1024xf32>
    %cst_32 = arith.constant 0.000000e+00 : f32
    %50 = vector.broadcast %cst_32 : f32 to vector<8x1024xf32>
    %51 = arith.maximumf %49, %50 : vector<8x1024xf32>
    %52 = vector.broadcast %7 : vector<8x1xf32> to vector<8x1024xf32>
    %53 = arith.mulf %52, %51 : vector<8x1024xf32>
    %cst_33 = arith.constant dense<0.000000e+00> : vector<1024xf32>
    %54 = vector.multi_reduction <add>, %53, %cst_33 [0] : vector<8x1024xf32> to vector<1024xf32>
    %55 = vector.shape_cast %54 : vector<1024xf32> to vector<1x1024xf32>
    %56 = vector.broadcast %8 : vector<1x1xf32> to vector<1x1024xf32>
    %57 = arith.addf %55, %56 : vector<1x1024xf32>
    %58 = vector.extract_strided_slice %57 {offsets = [0, 0], sizes = [1, 256], strides = [1, 1]} : vector<1x1024xf32> to vector<1x256xf32>
    %59 = vector.extract_strided_slice %57 {offsets = [0, 256], sizes = [1, 256], strides = [1, 1]} : vector<1x1024xf32> to vector<1x256xf32>
    %60 = arith.maximumf %58, %59 : vector<1x256xf32>
    %61 = vector.extract_strided_slice %57 {offsets = [0, 512], sizes = [1, 256], strides = [1, 1]} : vector<1x1024xf32> to vector<1x256xf32>
    %62 = arith.maximumf %60, %61 : vector<1x256xf32>
    %63 = vector.extract_strided_slice %57 {offsets = [0, 768], sizes = [1, 256], strides = [1, 1]} : vector<1x1024xf32> to vector<1x256xf32>
    %64 = arith.maximumf %62, %63 : vector<1x256xf32>
    %c0_34 = arith.constant 0 : index
    %c0_35 = arith.constant 0 : index
    %c0_36 = arith.constant 0 : index
    %c0_37 = arith.constant 0 : index
    %65 = vector.load %arg11[%c0_34, %c0_35, %c0_36, %c0_37] : memref<1x1x1x256xf32, #tpu.memory_space<vmem>>, vector<1x1x1x256xf32>
    %66 = vector.shape_cast %65 : vector<1x1x1x256xf32> to vector<1x256xf32>
    %67 = arith.maximumf %66, %64 : vector<1x256xf32>
    %c0_38 = arith.constant 0 : index
    %c0_39 = arith.constant 0 : index
    %c0_40 = arith.constant 0 : index
    %c0_41 = arith.constant 0 : index
    %68 = vector.load %arg11[%c0_38, %c0_39, %c0_40, %c0_41] : memref<1x1x1x256xf32, #tpu.memory_space<vmem>>, vector<1x1x1x256xf32>
    %69 = vector.shape_cast %68 : vector<1x1x1x256xf32> to vector<1x256xf32>
    %70 = vector.shape_cast %67 : vector<1x256xf32> to vector<1x1x1x256xf32>
    tpu.vector_store %arg11[%c0_38, %c0_39, %c0_40, %c0_41], %70 {strides = array<i32>} : memref<1x1x1x256xf32, #tpu.memory_space<vmem>>, vector<1x1x1x256xf32>,
    %c0_i32_42 = arith.constant 0 : i32
    %71 = arith.cmpi eq, %arg3, %c0_i32_42 : i32
    %72 = arith.extui %71 : i1 to i32
    %c0_i32_43 = arith.constant 0 : i32
    %73 = arith.cmpi ne, %72, %c0_i32_43 : i32
    scf.if %73 {
      %c0_44 = arith.constant 0 : index
      %c0_45 = arith.constant 0 : index
      %c0_46 = arith.constant 0 : index
      %c0_47 = arith.constant 0 : index
      %74 = vector.load %arg11[%c0_44, %c0_45, %c0_46, %c0_47] : memref<1x1x1x256xf32, #tpu.memory_space<vmem>>, vector<1x1x1x256xf32>
      %75 = vector.shape_cast %74 : vector<1x1x1x256xf32> to vector<1x256xf32>
      %76 = arith.negf %75 : vector<1x256xf32>
      %77 = math.exp %76 : vector<1x256xf32>
      %cst_48 = arith.constant 1.000000e+00 : f32
      %78 = vector.broadcast %cst_48 : f32 to vector<1x256xf32>
      %79 = arith.addf %78, %77 : vector<1x256xf32>
      %80 = arith.divf %78, %79 : vector<1x256xf32>
      %c0_49 = arith.constant 0 : index
      %c0_50 = arith.constant 0 : index
      %c0_51 = arith.constant 0 : index
      %c0_52 = arith.constant 0 : index
      %81 = vector.load %arg11[%c0_49, %c0_50, %c0_51, %c0_52] : memref<1x1x1x256xf32, #tpu.memory_space<vmem>>, vector<1x1x1x256xf32>
      %82 = vector.shape_cast %81 : vector<1x1x1x256xf32> to vector<1x256xf32>
      %83 = vector.shape_cast %80 : vector<1x256xf32> to vector<1x1x1x256xf32>
      tpu.vector_store %arg11[%c0_49, %c0_50, %c0_51, %c0_52], %83 {strides = array<i32>} : memref<1x1x1x256xf32, #tpu.memory_space<vmem>>, vector<1x1x1x256xf32>,
    } else {
    }
    return
  }
  func.func @transform_0(%arg0: i32, %arg1: i32, %arg2: i32, %arg3: i32) -> (i32, i32, i32) {
    %c1_i32 = arith.constant 1 : i32
    %0 = arith.muli %arg0, %c1_i32 : i32
    %1 = arith.addi %0, %arg3 : i32
    %c1_i32_0 = arith.constant 1 : i32
    %2 = arith.muli %1, %c1_i32_0 : i32
    %3 = arith.addi %2, %arg2 : i32
    %c0_i32 = arith.constant 0 : i32
    %c0_i32_1 = arith.constant 0 : i32
    return %arg1, %c0_i32, %3 : i32, i32, i32
  }
  func.func @transform_1(%arg0: i32, %arg1: i32, %arg2: i32, %arg3: i32) -> (i32, i32) {
    %c0_i32 = arith.constant 0 : i32
    %c0_i32_0 = arith.constant 0 : i32
    %c0_i32_1 = arith.constant 0 : i32
    return %c0_i32, %c0_i32_0 : i32, i32
  }
  func.func @transform_2(%arg0: i32, %arg1: i32, %arg2: i32, %arg3: i32) -> (i32, i32) {
    %c0_i32 = arith.constant 0 : i32
    %c0_i32_0 = arith.constant 0 : i32
    %c0_i32_1 = arith.constant 0 : i32
    return %c0_i32, %c0_i32_0 : i32, i32
  }
  func.func @transform_3(%arg0: i32, %arg1: i32, %arg2: i32, %arg3: i32) -> (i32, i32) {
    %c0_i32 = arith.constant 0 : i32
    %c0_i32_0 = arith.constant 0 : i32
    %c0_i32_1 = arith.constant 0 : i32
    return %c0_i32, %c0_i32_0 : i32, i32
  }
  func.func @transform_4(%arg0: i32, %arg1: i32, %arg2: i32, %arg3: i32) -> (i32, i32) {
    %c0_i32 = arith.constant 0 : i32
    %c0_i32_0 = arith.constant 0 : i32
    %c0_i32_1 = arith.constant 0 : i32
    return %c0_i32, %c0_i32_0 : i32, i32
  }
  func.func @transform_5(%arg0: i32, %arg1: i32, %arg2: i32, %arg3: i32) -> (i32, i32) {
    %c0_i32 = arith.constant 0 : i32
    %c0_i32_0 = arith.constant 0 : i32
    %c0_i32_1 = arith.constant 0 : i32
    return %c0_i32, %c0_i32_0 : i32, i32
  }
  func.func @transform_6(%arg0: i32, %arg1: i32, %arg2: i32, %arg3: i32) -> (i32, i32) {
    %c0_i32 = arith.constant 0 : i32
    %c0_i32_0 = arith.constant 0 : i32
    %c0_i32_1 = arith.constant 0 : i32
    return %c0_i32, %c0_i32_0 : i32, i32
  }
  func.func @transform_7(%arg0: i32, %arg1: i32, %arg2: i32, %arg3: i32) -> (i32, i32, i32, i32) {
    %c0_i32 = arith.constant 0 : i32
    %c0_i32_0 = arith.constant 0 : i32
    return %arg0, %arg1, %c0_i32, %arg2 : i32, i32, i32, i32
  }
}

</mosaic_0001>

<bundles_post_ra>
// kernel: tpu_custom_call.1
= control target key start
LH: loop header
LB: loop body
LE: loop exit
PB: predicated region body
PF: predicated region fallthrough
CT: control target
= control target key end

     0   :  { %s1979_s0 = inlined_call_operand.hbm [shape: bf16[2,4,2048], index: 0, kind: input, shape index: {}]   ;;  %s1980_s1 = inlined_call_operand.vmem [shape: bf16[16,4], index: 1, kind: input, shape index: {}]   ;;  %s1981_s2 = inlined_call_operand.vmem [shape: f32[16,1], index: 2, kind: input, shape index: {}]   ;;  %s1982_s3 = inlined_call_operand.vmem [shape: f32[8,16], index: 3, kind: input, shape index: {}]   ;;  %s1983_s4 = inlined_call_operand.vmem [shape: f32[8,1], index: 4, kind: input, shape index: {}]   ;;  %s1984_s5 = inlined_call_operand.vmem [shape: f32[8,1], index: 5, kind: input, shape index: {}]   ;;  %s1985_s6 = inlined_call_operand.<no memory space> [shape: f32[1,1], index: 6, kind: input, shape index: {}]   ;;  %s1986_s7 = inlined_call_operand.hbm [shape: f32[1,2,1,256], index: 7, kind: output, shape index: {}]  }
   0x1   :  { %v12_v0 = vstv %s1985_s6 }
   0x2   :  { %13 = vst [vmem:[#allocation2] sm:$0x1] %v12_v0 }
   0x3   :  { %14 = vsyncpa [#allocation4], 0 }
   0x4   :  { %16 = vsyncpa [#allocation4 + $0x1], 0 }
   0x5   :  { %17 = vsyncpa [#allocation5], 0 }
   0x6   :  { %19 = vsyncpa [#allocation5 + $0x1], 0  ;;  %s1636_s26 = smov 0   ;;  %s1638_s27 = smov 0  }
   0x7   :  { %s1640_s28 = smov 0   ;;  %s1642_s29 = smov 0  }
   0x8   :  { %s1644_s30 = smov 0   ;;  %s1646_s8 = smov 0  }
   0x9 LB: > { %s1353_s6 = sadd.s32 4294967295, %s1589_s8   ;;  %s1354_s9 = sadd.s32 4294967294, %s1589_s8   ;;  %s1589_s8 = sphi %s1646_s8, %s25_s8   ;;  %s1585_s30 = sphi %s1644_s30, %s1997_s30   ;;  %s1581_s29 = sphi %s1642_s29, %s1996_s29   ;;  %s1577_s28 = sphi %s1640_s28, %s1995_s28   ;;  %s1573_s27 = sphi %s1638_s27, %s1994_s27   ;;  %s1569_s26 = sphi %s1636_s26, %s1993_s26  }
   0xa   : > { %s47_s10 = sadd.s32 1, %s1585_s30  ;;  %s64_s11 = sadd.s32 1, %s1577_s28 }
   0xb   : > { %p49_p0 = scmp.ge.s32.totalorder %s47_s10, 2  ;;  %p71_p1 = scmp.ne.s32.totalorder %s1577_s28, %s1573_s27 }
   0xc   : > { %p72_p2 = scmp.eq.s32.totalorder %s1589_s8, 0  ;;  %p77_p3 = scmp.ne.s32.totalorder %s1573_s27, %s1569_s26 }
   0xd   : > { %s1999_s10 = smov (%p49_p0, %s47_s10), 0  ;;  %p78_p5 = scmp.eq.s32.totalorder %s1353_s6, 0 }
   0xe   : > { %p1677_p4 = por %p72_p2, %p71_p1  ;;  %s59_s13 = ssub.s32 %s1585_s30, %s1999_s10 }
   0xf   : > { %p231_p6 = scmp.eq.s32.totalorder %s1353_s6, 1  ;;  %p62_p7 = scmp.eq.s32.totalorder %s59_s13, 0 }
  0x10   : > { %p1683_p8 = por %p78_p5, %p77_p3  ;;  %p237_p10 = scmp.eq.s32.totalorder %s1354_s9, 1 }
  0x11   : > { %p1687_p9 = por %p231_p6, %p71_p1  ;;  %p1356_p12 = scmp.ge.s32.totalorder %s1589_s8, 2 }
  0x12   : > { %s1692_s16 = scalar_select %p62_p7, %s1577_s28, %s64_s11  }
  0x13   : > { %p1694_p11 = por %p237_p10, %p77_p3  ;;  %p1418_p13 = scmp.lt.s32.totalorder %s1589_s8, 2 }
  0x14   : > { %s275_s18 = sand.u32 1, %s1577_s28   ;;  %s1404_s20 = sshll.u32 %s1585_s30, 5 }
  0x15   : > { %s1357_s19 = sshll.u32 %s275_s18, 5  ;;  %s288_s23 = scalar_lea.hbm %s1979_s0, %s1404_s20 }
  0x16   : > { %s279_s24 = scalar_lea.vmem [#allocation3], %s1357_s19  ;;  %s290_s6 = sshll.u32 %s288_s23, 4  ;;  %s291_s6 = int_to_ptr.hbm [resolvable:$true] %s290_s6 }
  0x17   : > { %s292_s25 = sshll.u32 %s279_s24, 4  ;;  %p1411_p0 = pnand %p1418_p13, %p1677_p4  ;;  %s293_s25 = int_to_ptr.vmem [resolvable:$true] %s292_s25 }
  0x18   : > { %p1360_p1 = scmp.ge.s32.totalorder %s1589_s8, 1  ;;  %p297_p2 = scmp.lt.s32.totalorder %s1589_s8, 3 }
  0x19   : > { %s276_s9 = scalar_lea.sflag [#allocation4], %s275_s18 }
  0x1a   : > { %1413 = dma.hbm_to_vmem [thread:$0]  (!%p1411_p0), %s291_s6, 512, %s293_s25, %s276_s9  }
  0x1b   : > { %p298_p3 = pnand %p1360_p1, %p297_p2 }
  0x1c   : > { %s1710_s11 = sand.u32 (!%p298_p3), 1, %s1573_s27  }
  0x1d   : > { %301 = sbr.rel (%p298_p3) target bundleno = 582 (0x246), region = 48  ;;  %s1361_s13 = sshll.u32 (!%p298_p3), %s1710_s11, 5 }
  0x1e   : > { %s304_s19 = scalar_lea.sflag (!%p298_p3), [#allocation4], %s1710_s11  ;;  %s1714_s20 = scalar_lea.vmem (!%p298_p3), [#allocation3], %s1361_s13 }
  0x22   : > { %1560 = dma.done.wait (%p1683_p8), %s304_s19, 512  }
  0x23   : > { %1562 = vsyncadd (%p1683_p8), %s304_s19, 4294966784  ;;  %v1591_v1 = vmov 0   ;;  %v361_v2 = vld [vmem:[%s1714_s20] sm:$0xff]  ;;  %v362_v3 = vld [vmem:[%s1714_s20 + $0x8] sm:$0xff]  ;;  %vm395_vm0 = vcmask 1041408   ;;  %vm391_vm1 = vcmask 31744  }
  0x24   : > { %1470 = vset.pattern.permute.xlu0 %v1591_v1  ;;  %1471 = vset.pattern.permute.xlu1 %v1591_v1  ;;  %379 = vst [vmem:[#allocation1] ss:$4 sm:$0xff] %v361_v2  ;;  %v356_v4 = vld [vmem:[%s1981_s2 + $0x8] sm:$0xff]  ;;  %v811_v5 = vld [vmem:[%s1714_s20 + $0x10] sm:$0xff]  ;;  %vm545_vm2 = vcmask 130048   ;;  %vm802_vm4 = vcmask 1040384  }
  0x25   : > { %1472 = vset.pattern.permute.xlu2 %v1591_v1  ;;  %382 = vst [vmem:[#allocation1 + $0x20] ss:$4 sm:$0xff] %v362_v3  ;;  %370 = vperm.xlu0 %1470, %v356_v4   ;;  %v355_v6 = vld [vmem:[%s1981_s2] sm:$0xff]  ;;  %s1401_s18 = sshll.u32 %s1581_s29, 1  ;;  %s1241_s29 = scalar_lea.sflag [#allocation5], %s1710_s11 }
  0x26   : > { %v1734_v12 = vld [vmem:[%s1980_s1] sm:$0xff]  ;;  %s1255_s22 = scalar_lea.hbm %s1986_s7, %s1401_s18  ;;  %s1527_s19 = scalar_lea.hbm %s1986_s7, 4 }
  0x27   : > { %v812_v19 = vld [vmem:[%s1714_s20 + $0x18] sm:$0xff]  ;;  %s1362_s20 = sshll.u32 %s1710_s11, 1  ;;  %s1259_s24 = sshll.u32 %s1255_s22, 4  ;;  %s1260_s24 = int_to_ptr.hbm [resolvable:$true] %s1259_s24 }
  0x28   : > { %v358_v28 = vld [vmem:[%s1983_s4] sm:$0xff]  ;;  %s1845_s12 = scalar_lea.vmem [#allocation6], %s1362_s20  ;;  %s1521_s25 = sshra.s32 %s1260_s24, 4  ;;  %s1522_s25 = int_to_ptr.hbm [resolvable:$true] %s1521_s25 }
  0x29   : > { %542 = vperm.xlu1 %1471, %v358_v28   ;;  %v359_v40 = vld [vmem:[%s1984_s5] sm:$0xff]  ;;  %s1257_s23 = sshll.u32 %s1845_s12, 4  ;;  %s1523_s6 = scalar_lea.hbm %s1522_s25, 2  ;;  %s1258_s23 = int_to_ptr.vmem [resolvable:$true] %s1257_s23 }
  0x2a   : > { %v1776_v43 = vld [vmem:[%s1982_s3] sm:$0xff]  ;;  %p1524_p4 = scmp.ne.s32.totalorder %s1522_s25, %s1523_s6  ;;  %p1528_p7 = scmp.lt.s32.totalorder %s1522_s25, %s1986_s7 }
  0x2b   : > { %v383_v7 = vld.sshfl [vmem:[#allocation1] sm:$0xff pattern:$0x73625140]  ;;  %v384_v8 = vld.sshfl [vmem:[#allocation1 + $0x8] sm:$0xff pattern:$0x73625140]  ;;  %p1529_p8 = scmp.lt.s32.totalorder %s1527_s19, %s1523_s6 }
  0x2c   : > { %v396_v9 = vsel %vm395_vm0, %v383_v7, 0  ;;  %v398_v10 = vsel %vm395_vm0, %v384_v8, 0  ;;  %v385_v11 = vld.sshfl [vmem:[#allocation1 + $0x10] sm:$0xff pattern:$0x73625140]  ;;  %p1525_p5 = pnand %p1524_p4, %p1687_p9 }
  0x2d   : > { %419 = vmatpush.bf16.msra.mxu0 %v396_v9  ;;  %433 = vmatpush.bf16.msra.mxu1 %v398_v10  ;;  %v400_v13 = vsel %vm395_vm0, %v385_v11, 0  ;;  %v386_v14 = vld.sshfl [vmem:[#allocation1 + $0x18] sm:$0xff pattern:$0x73625140]  ;;  %p1530_p10 = por %p1529_p8, %p1528_p7 }
  0x2e   : > { %447 = vmatpush.bf16.msra.mxu2 %v400_v13  ;;  %v402_v15 = vsel %vm395_vm0, %v386_v14, 0  ;;  %814 = vst [vmem:[#allocation1] ss:$4 sm:$0xff] %v811_v5  ;;  %v390_v16 = vld.sshfl [vmem:[#allocation1 + $0x38] sm:$0xff pattern:$0x73625140]  ;;  %365 = vperm.xlu0 %1470, %v355_v6   ;;  %p1526_p6 = pneg %p1525_p5 }
  0x2f   : > { %461 = vmatpush.bf16.msra.mxu3 %v402_v15  ;;  %v410_v17 = vsel %vm395_vm0, %v390_v16, 0  ;;  %v389_v18 = vld.sshfl [vmem:[#allocation1 + $0x30] sm:$0xff pattern:$0x73625140] }
  0x30   : > { %1367 = vmatmul.msk.bf16.vlgmr.msra.gmra.mxu0 %vm391_vm1, %v1734_v12  ;;  %1368 = vmatmul.msk.bf16.vlgmr.msra.gmra.mxu1 %vm391_vm1, %v1734_v12  ;;  %v408_v20 = vsel %vm395_vm0, %v389_v18, 0  ;;  %v387_v21 = vld.sshfl [vmem:[#allocation1 + $0x20] sm:$0xff pattern:$0x73625140]  ;;  %p1531_p13 = pnand %p1530_p10, %p1526_p6 }
  0x31   : > { %1369 = vmatmul.msk.bf16.vlgmr.msra.gmra.mxu2 %vm391_vm1, %v1734_v12  ;;  %v404_v22 = vsel %vm395_vm0, %v387_v21, 0  ;;  %v388_v23 = vld.sshfl [vmem:[#allocation1 + $0x28] sm:$0xff pattern:$0x73625140]  ;;  %719 = vperm.xlu1 %1471, %v359_v40  }
  0x32   : > { %1370 = vmatmul.msk.bf16.vlgmr.msra.gmra.mxu3 %vm391_vm1, %v1734_v12  ;;  %503 = vmatpush.bf16.msrb.mxu2 %v408_v20  ;;  %v406_v24 = vsel %vm395_vm0, %v388_v23, 0  ;;  %817 = vst [vmem:[#allocation1 + $0x20] ss:$4 sm:$0xff] %v812_v19 }
  0x33   : > { %517 = vmatpush.bf16.msrb.mxu3 %v410_v17  ;;  %475 = vmatpush.bf16.msrb.mxu0 %v404_v22  ;;  %v360_v17 = vld [vmem:[#allocation2] sm:$0x1] }
  0x34   : > { %489 = vmatpush.bf16.msrb.mxu1 %v406_v24  ;;  %780 = vperm.xlu2 %1472, %v360_v17  }
  0x35   : > { %v818_v0 = vld.sshfl [vmem:[#allocation1] sm:$0xff pattern:$0x73625140]  ;;  %v819_v2 = vld.sshfl [vmem:[#allocation1 + $0x8] sm:$0xff pattern:$0x73625140] }
  0x36   : > { %v826_v8 = vsel %vm395_vm0, %v818_v0, 0  ;;  %v828_v10 = vsel %vm395_vm0, %v819_v2, 0  ;;  %v820_v21 = vld.sshfl [vmem:[#allocation1 + $0x10] sm:$0xff pattern:$0x73625140] }
  0x37   : > { %v821_v23 = vld.sshfl [vmem:[#allocation1 + $0x18] sm:$0xff pattern:$0x73625140] }
  0x39   : > { %v822_v4 = vld.sshfl [vmem:[#allocation1 + $0x20] sm:$0xff pattern:$0x73625140]  ;;  %v823_v6 = vld.sshfl [vmem:[#allocation1 + $0x28] sm:$0xff pattern:$0x73625140] }
  0x3a   : > { %v834_v11 = vsel %vm395_vm0, %v822_v4, 0  ;;  %v836_v16 = vsel %vm395_vm0, %v823_v6, 0  ;;  %v825_v28 = vld.sshfl [vmem:[#allocation1 + $0x38] sm:$0xff pattern:$0x73625140] }
  0x40   : > { %1371 = vmatmul.msk.bf16.vlgmr.msrb.gmra.mxu0 %vm391_vm1, %v1734_v12  ;;  %1372 = vmatmul.msk.bf16.vlgmr.msrb.gmra.mxu1 %vm391_vm1, %v1734_v12 }
  0x41   : > { %1373 = vmatmul.msk.bf16.vlgmr.msrb.gmra.mxu2 %vm391_vm1, %v1734_v12 }
  0x42   : > { %1374 = vmatmul.msk.bf16.vlgmr.msrb.gmra.mxu3 %vm391_vm1, %v1734_v12 }
  0x97   : > { %v1759_v25 = vpop.permute.xlu0 %370 }
  0xa0   : > { %v1764_v29 = vpop.permute.xlu0 %365 }
  0xad   : > { %v421_v26 = vpop.f32.mrf.mxu0  ;;  %v435_v27 = vpop.f32.mrf.mxu1 }
  0xae   : > { %v422_v31 = vadd.f32 %v421_v26, %v1764_v29  ;;  %v436_v34 = vadd.f32 %v435_v27, %v1764_v29  ;;  %v824_v26 = vld.sshfl [vmem:[#allocation1 + $0x30] sm:$0xff pattern:$0x73625140] }
  0xb0   : > { %v524_v39 = vmax.f32 %v422_v31, 0.0  ;;  %v525_v42 = vmax.f32 %v436_v34, 0.0  ;;  %v832_v31 = vsel %vm395_vm0, %v821_v23, 0  ;;  %v1830_v34 = vpop.permute.xlu1 %542 }
  0xb4   : > { %v449_v30 = vpop.f32.mrf.mxu2 }
  0xb5   : > { %v463_v32 = vpop.f32.mrf.mxu3  ;;  %v423_v33 = vpop.f32.mrf.mxu0  ;;  %v450_v45 = vadd.f32 %v449_v30, %v1764_v29  ;;  %v830_v30 = vsel %vm395_vm0, %v820_v21, 0 }
  0xb6   : > { %v424_v35 = vadd.f32 %v423_v33, %v1759_v25  ;;  %v437_v36 = vpop.f32.mrf.mxu1  ;;  %v464_v49 = vadd.f32 %v463_v32, %v1764_v29  ;;  %v838_v32 = vsel %vm395_vm0, %v824_v26, 0  ;;  %v840_v33 = vsel %vm395_vm0, %v825_v28, 0 }
  0xb7   : > { %v438_v37 = vadd.f32 %v437_v36, %v1759_v25  ;;  %v526_v54 = vmax.f32 %v450_v45, 0.0 }
  0xb8   : > { %v532_v38 = vmax.f32 %v424_v35, 0.0  ;;  %v527_v55 = vmax.f32 %v464_v49, 0.0  ;;  %v1834_v40 = vpop.permute.xlu1 %719 }
  0xb9   : > { %v533_v41 = vmax.f32 %v438_v37, 0.0 }
  0xba   : > { %563 = vmatpush.msra.mxu0 %v532_v38 }
  0xbb   : > { %583 = vmatpush.msra.mxu1 %v533_v41 }
  0xbc   : > { %v451_v44 = vpop.f32.mrf.mxu2  ;;  %564 = vmatpush.msra.mxu0 %v524_v39 }
  0xbd   : > { %v452_v46 = vadd.f32 %v451_v44, %v1759_v25  ;;  %v465_v47 = vpop.f32.mrf.mxu3  ;;  %v477_v48 = vpop.f32.mrf.mxu0  ;;  %584 = vmatpush.msra.mxu1 %v525_v42  ;;  %1375 = vmatmul.msk.f32.vlgmr.msra.gmra.mxu0 %vm545_vm2, %v1776_v43 }
  0xbe   : > { %v466_v50 = vadd.f32 %v465_v47, %v1759_v25  ;;  %v491_v51 = vpop.f32.mrf.mxu1  ;;  %1376 = vmatmul.msk.f32.vlgmr.msra.gmra.mxu1 %vm545_vm2, %v1776_v43  ;;  %v478_v59 = vadd.f32 %v477_v48, %v1764_v29 }
  0xbf   : > { %v534_v52 = vmax.f32 %v452_v46, 0.0  ;;  %v492_v62 = vadd.f32 %v491_v51, %v1764_v29  ;;  %v348_v46 = vlaneseq }
  0xc0   : > { %v535_v53 = vmax.f32 %v466_v50, 0.0  ;;  %v528_v5 = vmax.f32 %v478_v59, 0.0 }
  0xc1   : > { %603 = vmatpush.msra.mxu2 %v534_v52  ;;  %v529_v7 = vmax.f32 %v492_v62, 0.0  ;;  %vm1841_vm3 = vcmp.lt.s32.totalorder %v348_v46, 256 }
  0xc2   : > { %623 = vmatpush.msra.mxu3 %v535_v53  ;;  %v1592_v53 = vmov -inf  }
  0xc3   : > { %604 = vmatpush.msra.mxu2 %v526_v54  ;;  %352 = vst.msk [vmem:[%s1845_s12] sm:$0x3] %vm1841_vm3, %v1592_v53 }
  0xc4   : > { %624 = vmatpush.msra.mxu3 %v527_v55  ;;  %v505_v56 = vpop.f32.mrf.mxu2  ;;  %1377 = vmatmul.msk.f32.vlgmr.msra.gmra.mxu2 %vm545_vm2, %v1776_v43 }
  0xc5   : > { %v519_v57 = vpop.f32.mrf.mxu3  ;;  %v479_v58 = vpop.f32.mrf.mxu0  ;;  %1378 = vmatmul.msk.f32.vlgmr.msra.gmra.mxu3 %vm545_vm2, %v1776_v43  ;;  %v506_v13 = vadd.f32 %v505_v56, %v1764_v29 }
  0xc6   : > { %v480_v60 = vadd.f32 %v479_v58, %v1759_v25  ;;  %v493_v61 = vpop.f32.mrf.mxu1  ;;  %v520_v18 = vadd.f32 %v519_v57, %v1764_v29 }
  0xc7   : > { %v494_v63 = vadd.f32 %v493_v61, %v1759_v25  ;;  %v530_v24 = vmax.f32 %v506_v13, 0.0 }
  0xc8   : > { %v536_v1 = vmax.f32 %v480_v60, 0.0  ;;  %v531_v27 = vmax.f32 %v520_v18, 0.0 }
  0xc9   : > { %v537_v3 = vmax.f32 %v494_v63, 0.0 }
  0xca   : > { %643 = vmatpush.msrb.mxu0 %v536_v1 }
  0xcb   : > { %663 = vmatpush.msrb.mxu1 %v537_v3 }
  0xcc   : > { %v507_v9 = vpop.f32.mrf.mxu2  ;;  %644 = vmatpush.msrb.mxu0 %v528_v5 }
  0xcd   : > { %v508_v14 = vadd.f32 %v507_v9, %v1759_v25  ;;  %v521_v15 = vpop.f32.mrf.mxu3  ;;  %664 = vmatpush.msrb.mxu1 %v529_v7  ;;  %1379 = vmatmul.msk.f32.vlgmr.msrb.gmra.mxu0 %vm545_vm2, %v1776_v43 }
  0xce   : > { %v522_v19 = vadd.f32 %v521_v15, %v1759_v25  ;;  %1380 = vmatmul.msk.f32.vlgmr.msrb.gmra.mxu1 %vm545_vm2, %v1776_v43  ;;  %849 = vmatpush.bf16.msra.mxu0 %v826_v8 }
  0xcf   : > { %v538_v20 = vmax.f32 %v508_v14, 0.0  ;;  %863 = vmatpush.bf16.msra.mxu1 %v828_v10 }
  0xd0   : > { %v539_v22 = vmax.f32 %v522_v19, 0.0 }
  0xd1   : > { %683 = vmatpush.msrb.mxu2 %v538_v20 }
  0xd2   : > { %905 = vmatpush.bf16.msrb.mxu0 %v834_v11  ;;  %703 = vmatpush.msrb.mxu3 %v539_v22 }
  0xd3   : > { %919 = vmatpush.bf16.msrb.mxu1 %v836_v16  ;;  %684 = vmatpush.msrb.mxu2 %v530_v24 }
  0xd4   : > { %704 = vmatpush.msrb.mxu3 %v531_v27  ;;  %1381 = vmatmul.msk.f32.vlgmr.msrb.gmra.mxu2 %vm545_vm2, %v1776_v43 }
  0xd5   : > { %1382 = vmatmul.msk.f32.vlgmr.msrb.gmra.mxu3 %vm545_vm2, %v1776_v43  ;;  %1383 = vmatmul.msk.bf16.vlgmr.msra.gmra.mxu0 %vm391_vm1, %v1734_v12 }
  0xd6   : > { %1384 = vmatmul.msk.bf16.vlgmr.msra.gmra.mxu1 %vm391_vm1, %v1734_v12  ;;  %877 = vmatpush.bf16.msra.mxu2 %v830_v30 }
  0xd7   : > { %891 = vmatpush.bf16.msra.mxu3 %v832_v31 }
  0xda   : > { %933 = vmatpush.bf16.msrb.mxu2 %v838_v32  ;;  %v781_v32 = vpop.permute.xlu2 %780 }
  0xdb   : > { %947 = vmatpush.bf16.msrb.mxu3 %v840_v33 }
  0xdc   : > { %1385 = vmatmul.msk.bf16.vlgmr.msra.gmra.mxu2 %vm391_vm1, %v1734_v12 }
  0xdd   : > { %1386 = vmatmul.msk.bf16.vlgmr.msra.gmra.mxu3 %vm391_vm1, %v1734_v12 }
  0xe5   : > { %1387 = vmatmul.msk.bf16.vlgmr.msrb.gmra.mxu0 %vm391_vm1, %v1734_v12 }
  0xe6   : > { %1388 = vmatmul.msk.bf16.vlgmr.msrb.gmra.mxu1 %vm391_vm1, %v1734_v12 }
  0xec   : > { %1389 = vmatmul.msk.bf16.vlgmr.msrb.gmra.mxu2 %vm391_vm1, %v1734_v12 }
  0xed   : > { %1390 = vmatmul.msk.bf16.vlgmr.msrb.gmra.mxu3 %vm391_vm1, %v1734_v12 }
 0x13a   : > { %v566_v36 = vpop.f32.mrf.mxu0 }
 0x13b   : > { %v586_v35 = vpop.f32.mrf.mxu1  ;;  %v567_v38 = vadd.f32 %v566_v36, %v1830_v34 }
 0x13c   : > { %v587_v37 = vadd.f32 %v586_v35, %v1830_v34 }
 0x13d   : > { %v709_v41 = vmax.f32 %v567_v38, 0.0 }
 0x13e   : > { %v710_v39 = vmax.f32 %v587_v37, 0.0 }
 0x13f   : > { %v722_v44 = vmul.f32 %v1834_v40, %v709_v41 }
 0x140   : > { %v723_v42 = vmul.f32 %v1834_v40, %v710_v39 }
 0x141   : > { %v730_v54 = vrot.slane %v722_v44, 4 }
 0x142   : > { %v736_v50 = vrot.slane %v723_v42, 4 }
 0x143   : > { %v731_v0 = vadd.f32 %v730_v54, %v722_v44 }
 0x144   : > { %v737_v62 = vadd.f32 %v736_v50, %v723_v42  ;;  %v1864_v50 = vperm.slane %v781_v32, 0 }
 0x145   : > { %v732_v10 = vrot.slane %v731_v0, 2 }
 0x146   : > { %v738_v6 = vrot.slane %v737_v62, 2 }
 0x147   : > { %v606_v45 = vpop.f32.mrf.mxu2  ;;  %v733_v19 = vadd.f32 %v732_v10, %v731_v0 }
 0x148   : > { %v626_v12 = vpop.f32.mrf.mxu3  ;;  %v607_v47 = vadd.f32 %v606_v45, %v1830_v34  ;;  %v739_v18 = vadd.f32 %v738_v6, %v737_v62 }
 0x149   : > { %v627_v48 = vadd.f32 %v626_v12, %v1830_v34  ;;  %v734_v35 = vrot.slane %v733_v19, 1 }
 0x14a   : > { %v711_v51 = vmax.f32 %v607_v47, 0.0  ;;  %v646_v52 = vpop.f32.mrf.mxu0  ;;  %v740_v30 = vrot.slane %v739_v18, 1 }
 0x14b   : > { %v712_v55 = vmax.f32 %v627_v48, 0.0  ;;  %v647_v56 = vadd.f32 %v646_v52, %v1830_v34  ;;  %v666_v57 = vpop.f32.mrf.mxu1 }
 0x14c   : > { %v667_v58 = vadd.f32 %v666_v57, %v1830_v34  ;;  %v724_v59 = vmul.f32 %v1834_v40, %v711_v51  ;;  %v741_v52 = vadd.f32 %v740_v30, %v739_v18 }
 0x14d   : > { %v713_v60 = vmax.f32 %v647_v56, 0.0  ;;  %v725_v61 = vmul.f32 %v1834_v40, %v712_v55 }
 0x14e   : > { %v714_v63 = vmax.f32 %v667_v58, 0.0  ;;  %v742_v1 = vrot.slane %v724_v59, 4  ;;  %v785_v6 = vadd.f32 %v1864_v50, %v741_v52 }
 0x14f   : > { %v726_v2 = vmul.f32 %v1834_v40, %v713_v60  ;;  %v748_v3 = vrot.slane %v725_v61, 4  ;;  %v735_v60 = vadd.f32 %v734_v35, %v733_v19 }
 0x150   : > { %v727_v4 = vmul.f32 %v1834_v40, %v714_v63  ;;  %v743_v5 = vadd.f32 %v742_v1, %v724_v59 }
 0x151   : > { %v749_v7 = vadd.f32 %v748_v3, %v725_v61  ;;  %v754_v8 = vrot.slane %v726_v2, 4  ;;  %v784_v10 = vadd.f32 %v1864_v50, %v735_v60 }
 0x152   : > { %v851_v9 = vpop.f32.mrf.mxu0  ;;  %v760_v11 = vrot.slane %v727_v4, 4  ;;  %v744_v14 = vrot.slane %v743_v5, 2 }
 0x153   : > { %v865_v13 = vpop.f32.mrf.mxu1  ;;  %v750_v15 = vrot.slane %v749_v7, 2  ;;  %v755_v16 = vadd.f32 %v754_v8, %v726_v2  ;;  %v852_v38 = vadd.f32 %v851_v9, %v1764_v29 }
 0x154   : > { %v761_v17 = vadd.f32 %v760_v11, %v727_v4  ;;  %v745_v23 = vadd.f32 %v744_v14, %v743_v5  ;;  %v866_v45 = vadd.f32 %v865_v13, %v1764_v29 }
 0x155   : > { %v751_v20 = vadd.f32 %v750_v15, %v749_v7  ;;  %v756_v27 = vrot.slane %v755_v16, 2  ;;  %v954_v57 = vmax.f32 %v852_v38, 0.0 }
 0x156   : > { %v762_v21 = vrot.slane %v761_v17, 2  ;;  %v746_v44 = vrot.slane %v745_v23, 1  ;;  %v955_v62 = vmax.f32 %v866_v45, 0.0 }
 0x157   : > { %v686_v22 = vpop.f32.mrf.mxu2  ;;  %v752_v36 = vrot.slane %v751_v20, 1  ;;  %v757_v47 = vadd.f32 %v756_v27, %v755_v16 }
 0x158   : > { %v687_v24 = vadd.f32 %v686_v22, %v1830_v34  ;;  %v706_v26 = vpop.f32.mrf.mxu3  ;;  %v763_v37 = vadd.f32 %v762_v21, %v761_v17  ;;  %v747_v61 = vadd.f32 %v746_v44, %v745_v23 }
 0x159   : > { %v707_v28 = vadd.f32 %v706_v26, %v1830_v34  ;;  %v753_v55 = vadd.f32 %v752_v36, %v751_v20  ;;  %v758_v1 = vrot.slane %v757_v47, 1 }
 0x15a   : > { %v715_v31 = vmax.f32 %v687_v24, 0.0  ;;  %v853_v33 = vpop.f32.mrf.mxu0  ;;  %v764_v56 = vrot.slane %v763_v37, 1  ;;  %v786_v11 = vadd.f32 %v1864_v50, %v747_v61 }
 0x15b   : > { %v716_v39 = vmax.f32 %v707_v28, 0.0  ;;  %v854_v41 = vadd.f32 %v853_v33, %v1759_v25  ;;  %v867_v42 = vpop.f32.mrf.mxu1  ;;  %v787_v7 = vadd.f32 %v1864_v50, %v753_v55  ;;  %v759_v14 = vadd.f32 %v758_v1, %v757_v47  ;;  %v798_v55 = vld [vmem:[%s1845_s12] sm:$0x3] }
 0x15c   : > { %v728_v46 = vmul.f32 %v1834_v40, %v715_v31  ;;  %v868_v12 = vadd.f32 %v867_v42, %v1759_v25  ;;  %v765_v5 = vadd.f32 %v764_v56, %v763_v37  ;;  %v792_v21 = vmax.f32 %v784_v10, %v786_v11 }
 0x15d   : > { %v729_v48 = vmul.f32 %v1834_v40, %v716_v39  ;;  %v962_v51 = vmax.f32 %v854_v41, 0.0  ;;  %v793_v18 = vmax.f32 %v785_v6, %v787_v7  ;;  %v788_v27 = vadd.f32 %v1864_v50, %v759_v14 }
 0x15e   : > { %v766_v53 = vrot.slane %v728_v46, 4  ;;  %v963_v54 = vmax.f32 %v868_v12, 0.0  ;;  %v789_v17 = vadd.f32 %v1864_v50, %v765_v5 }
 0x15f   : > { %v772_v58 = vrot.slane %v729_v48, 4  ;;  %v879_v59 = vpop.f32.mrf.mxu2  ;;  %984 = vmatpush.msra.mxu0 %v962_v51 }
 0x160   : > { %v767_v63 = vadd.f32 %v766_v53, %v728_v46  ;;  %v893_v0 = vpop.f32.mrf.mxu3  ;;  %1004 = vmatpush.msra.mxu1 %v963_v54  ;;  %v880_v23 = vadd.f32 %v879_v59, %v1764_v29  ;;  %v795_v35 = vmax.f32 %v793_v18, %v789_v17  ;;  %v794_v46 = vmax.f32 %v792_v21, %v788_v27 }
 0x161   : > { %v773_v2 = vadd.f32 %v772_v58, %v729_v48  ;;  %985 = vmatpush.msra.mxu0 %v954_v57  ;;  %v894_v30 = vadd.f32 %v893_v0, %v1764_v29 }
 0x162   : > { %v768_v3 = vrot.slane %v767_v63, 2  ;;  %1005 = vmatpush.msra.mxu1 %v955_v62  ;;  %v907_v4 = vpop.f32.mrf.mxu0  ;;  %1391 = vmatmul.msk.f32.vlgmr.msra.gmra.mxu0 %vm545_vm2, %v1776_v43  ;;  %v956_v42 = vmax.f32 %v880_v23, 0.0 }
 0x163   : > { %v774_v8 = vrot.slane %v773_v2, 2  ;;  %v921_v9 = vpop.f32.mrf.mxu1  ;;  %1392 = vmatmul.msk.f32.vlgmr.msra.gmra.mxu1 %vm545_vm2, %v1776_v43  ;;  %v908_v44 = vadd.f32 %v907_v4, %v1764_v29  ;;  %v957_v12 = vmax.f32 %v894_v30, 0.0 }
 0x164   : > { %v769_v13 = vadd.f32 %v768_v3, %v767_v63  ;;  %v922_v47 = vadd.f32 %v921_v9, %v1764_v29 }
 0x165   : > { %v775_v15 = vadd.f32 %v774_v8, %v773_v2  ;;  %v958_v57 = vmax.f32 %v908_v44, 0.0 }
 0x166   : > { %v770_v16 = vrot.slane %v769_v13, 1  ;;  %v959_v59 = vmax.f32 %v922_v47, 0.0 }
 0x167   : > { %v776_v19 = vrot.slane %v775_v15, 1  ;;  %v881_v20 = vpop.f32.mrf.mxu2 }
 0x168   : > { %v771_v22 = vadd.f32 %v770_v16, %v769_v13  ;;  %v882_v24 = vadd.f32 %v881_v20, %v1759_v25  ;;  %v895_v26 = vpop.f32.mrf.mxu3 }
 0x169   : > { %v777_v28 = vadd.f32 %v776_v19, %v775_v15  ;;  %v896_v31 = vadd.f32 %v895_v26, %v1759_v25 }
 0x16a   : > { %v964_v32 = vmax.f32 %v882_v24, 0.0  ;;  %v909_v33 = vpop.f32.mrf.mxu0  ;;  %v790_v39 = vadd.f32 %v1864_v50, %v771_v22 }
 0x16b   : > { %v965_v36 = vmax.f32 %v896_v31, 0.0  ;;  %v910_v37 = vadd.f32 %v909_v33, %v1759_v25  ;;  %v923_v38 = vpop.f32.mrf.mxu1  ;;  %v791_v41 = vadd.f32 %v1864_v50, %v777_v28 }
 0x16c   : > { %v924_v45 = vadd.f32 %v923_v38, %v1759_v25  ;;  %1024 = vmatpush.msra.mxu2 %v964_v32  ;;  %v796_v54 = vmax.f32 %v794_v46, %v790_v39 }
 0x16d   : > { %v966_v48 = vmax.f32 %v910_v37, 0.0  ;;  %1044 = vmatpush.msra.mxu3 %v965_v36  ;;  %v797_v51 = vmax.f32 %v795_v35, %v791_v41 }
 0x16e   : > { %v967_v52 = vmax.f32 %v924_v45, 0.0  ;;  %1025 = vmatpush.msra.mxu2 %v956_v42 }
 0x16f   : > { %1045 = vmatpush.msra.mxu3 %v957_v12  ;;  %v935_v53 = vpop.f32.mrf.mxu2  ;;  %1393 = vmatmul.msk.f32.vlgmr.msra.gmra.mxu2 %vm545_vm2, %v1776_v43  ;;  %v801_v56 = vrot.slane %v797_v51, 7 }
 0x170   : > { %v949_v58 = vpop.f32.mrf.mxu3  ;;  %1394 = vmatmul.msk.f32.vlgmr.msra.gmra.mxu3 %vm545_vm2, %v1776_v43  ;;  %1064 = vmatpush.msrb.mxu0 %v966_v48  ;;  %v936_v63 = vadd.f32 %v935_v53, %v1764_v29 }
 0x171   : > { %1084 = vmatpush.msrb.mxu1 %v967_v52  ;;  %v803_v60 = vsel %vm802_vm4, %v796_v54, %v801_v56  ;;  %v950_v2 = vadd.f32 %v949_v58, %v1764_v29 }
 0x172   : > { %1065 = vmatpush.msrb.mxu0 %v958_v57  ;;  %v805_v61 = vmax.f32 %v798_v55, %v803_v60  ;;  %v960_v6 = vmax.f32 %v936_v63, 0.0 }
 0x173   : > { %1085 = vmatpush.msrb.mxu1 %v959_v59  ;;  %1395 = vmatmul.msk.f32.vlgmr.msrb.gmra.mxu0 %vm545_vm2, %v1776_v43  ;;  %v961_v7 = vmax.f32 %v950_v2, 0.0 }
 0x174   : > { %1396 = vmatmul.msk.f32.vlgmr.msrb.gmra.mxu1 %vm545_vm2, %v1776_v43  ;;  %810 = vst.msk [vmem:[%s1845_s12] sm:$0x3] %vm1841_vm3, %v805_v61 }
 0x177   : > { %v937_v62 = vpop.f32.mrf.mxu2 }
 0x178   : > { %v938_v0 = vadd.f32 %v937_v62, %v1759_v25  ;;  %v951_v1 = vpop.f32.mrf.mxu3 }
 0x179   : > { %v952_v3 = vadd.f32 %v951_v1, %v1759_v25 }
 0x17a   : > { %v968_v4 = vmax.f32 %v938_v0, 0.0 }
 0x17b   : > { %v969_v5 = vmax.f32 %v952_v3, 0.0 }
 0x17c   : > { %1104 = vmatpush.msrb.mxu2 %v968_v4 }
 0x17d   : > { %1124 = vmatpush.msrb.mxu3 %v969_v5 }
 0x17e   : > { %1105 = vmatpush.msrb.mxu2 %v960_v6 }
 0x17f   : > { %1125 = vmatpush.msrb.mxu3 %v961_v7  ;;  %1397 = vmatmul.msk.f32.vlgmr.msrb.gmra.mxu2 %vm545_vm2, %v1776_v43 }
 0x180   : > { %1398 = vmatmul.msk.f32.vlgmr.msrb.gmra.mxu3 %vm545_vm2, %v1776_v43 }
 0x1df   : > { %v987_v8 = vpop.f32.mrf.mxu0 }
 0x1e0   : > { %v1007_v9 = vpop.f32.mrf.mxu1  ;;  %v988_v25 = vadd.f32 %v987_v8, %v1830_v34 }
 0x1e1   : > { %v1008_v29 = vadd.f32 %v1007_v9, %v1830_v34 }
 0x1e2   : > { %v1130_v14 = vmax.f32 %v988_v25, 0.0 }
 0x1e3   : > { %v1131_v10 = vmax.f32 %v1008_v29, 0.0 }
 0x1e4   : > { %v1138_v23 = vmul.f32 %v1130_v14, %v1834_v40 }
 0x1e5   : > { %v1139_v43 = vmul.f32 %v1131_v10, %v1834_v40 }
 0x1e6   : > { %v1146_v33 = vrot.slane %v1138_v23, 4 }
 0x1e7   : > { %v1152_v28 = vrot.slane %v1139_v43, 4 }
 0x1e8   : > { %v1147_v42 = vadd.f32 %v1146_v33, %v1138_v23 }
 0x1e9   : > { %v1153_v37 = vadd.f32 %v1152_v28, %v1139_v43 }
 0x1ea   : > { %v1148_v48 = vrot.slane %v1147_v42, 2 }
 0x1eb   : > { %v1154_v46 = vrot.slane %v1153_v37, 2 }
 0x1ec   : > { %v1149_v61 = vadd.f32 %v1148_v48, %v1147_v42 }
 0x1ed   : > { %v1155_v56 = vadd.f32 %v1154_v46, %v1153_v37 }
 0x1ee   : > { %v1150_v7 = vrot.slane %v1149_v61, 1 }
 0x1ef   : > { %v1156_v2 = vrot.slane %v1155_v56, 1 }
 0x1f0   : > { %v1067_v11 = vpop.f32.mrf.mxu0 }
 0x1f1   : > { %v1087_v13 = vpop.f32.mrf.mxu1  ;;  %v1068_v15 = vadd.f32 %v1067_v11, %v1830_v34  ;;  %v1157_v10 = vadd.f32 %v1156_v2, %v1155_v56 }
 0x1f2   : > { %v1088_v16 = vadd.f32 %v1087_v13, %v1830_v34  ;;  %v1027_v17 = vpop.f32.mrf.mxu2 }
 0x1f3   : > { %v1028_v18 = vadd.f32 %v1027_v17, %v1830_v34  ;;  %v1047_v19 = vpop.f32.mrf.mxu3  ;;  %v1134_v24 = vmax.f32 %v1068_v15, 0.0  ;;  %v1151_v15 = vadd.f32 %v1150_v7, %v1149_v61  ;;  %v1195_v43 = vadd.f32 %v1157_v10, %v1864_v50 }
 0x1f4   : > { %v1135_v20 = vmax.f32 %v1088_v16, 0.0  ;;  %v1048_v21 = vadd.f32 %v1047_v19, %v1830_v34 }
 0x1f5   : > { %v1132_v22 = vmax.f32 %v1028_v18, 0.0  ;;  %v1142_v35 = vmul.f32 %v1134_v24, %v1834_v40  ;;  %v1194_v23 = vadd.f32 %v1151_v15, %v1864_v50 }
 0x1f6   : > { %v1133_v26 = vmax.f32 %v1048_v21, 0.0  ;;  %v1143_v30 = vmul.f32 %v1135_v20, %v1834_v40 }
 0x1f7   : > { %v1140_v27 = vmul.f32 %v1132_v22, %v1834_v40  ;;  %v1170_v44 = vrot.slane %v1142_v35, 4 }
 0x1f8   : > { %v1141_v31 = vmul.f32 %v1133_v26, %v1834_v40  ;;  %v1176_v38 = vrot.slane %v1143_v30, 4 }
 0x1f9   : > { %v1158_v32 = vrot.slane %v1140_v27, 4  ;;  %v1171_v51 = vadd.f32 %v1170_v44, %v1142_v35  ;;  %v1208_v44 = vld [vmem:[%s1845_s12] sm:$0x3] }
 0x1fa   : > { %v1164_v36 = vrot.slane %v1141_v31, 4  ;;  %v1177_v12 = vadd.f32 %v1176_v38, %v1143_v30 }
 0x1fb   : > { %v1159_v39 = vadd.f32 %v1158_v32, %v1140_v27  ;;  %v1172_v62 = vrot.slane %v1171_v51, 2 }
 0x1fc   : > { %v1165_v41 = vadd.f32 %v1164_v36, %v1141_v31  ;;  %v1178_v57 = vrot.slane %v1177_v12, 2 }
 0x1fd   : > { %v1160_v47 = vrot.slane %v1159_v39, 2  ;;  %v1173_v8 = vadd.f32 %v1172_v62, %v1171_v51 }
 0x1fe   : > { %v1166_v45 = vrot.slane %v1165_v41, 2  ;;  %v1179_v3 = vadd.f32 %v1178_v57, %v1177_v12 }
 0x1ff   : > { %v1161_v58 = vadd.f32 %v1160_v47, %v1159_v39  ;;  %v1174_v16 = vrot.slane %v1173_v8, 1 }
 0x200   : > { %v1167_v52 = vadd.f32 %v1166_v45, %v1165_v41 }
 0x201   : > { %v1162_v4 = vrot.slane %v1161_v58, 1  ;;  %v1175_v24 = vadd.f32 %v1174_v16, %v1173_v8 }
 0x202   : > { %v1107_v53 = vpop.f32.mrf.mxu2  ;;  %v1168_v63 = vrot.slane %v1167_v52, 1 }
 0x203   : > { %v1108_v54 = vadd.f32 %v1107_v53, %v1830_v34  ;;  %v1127_v55 = vpop.f32.mrf.mxu3  ;;  %v1163_v11 = vadd.f32 %v1162_v4, %v1161_v58  ;;  %v1198_v33 = vadd.f32 %v1175_v24, %v1864_v50 }
 0x204   : > { %v1128_v59 = vadd.f32 %v1127_v55, %v1830_v34  ;;  %v1169_v9 = vadd.f32 %v1168_v63, %v1167_v52  ;;  %v1180_v34 = vrot.slane %v1179_v3, 1 }
 0x205   : > { %v1136_v60 = vmax.f32 %v1108_v54, 0.0  ;;  %v1196_v20 = vadd.f32 %v1163_v11, %v1864_v50 }
 0x206   : > { %v1137_v0 = vmax.f32 %v1128_v59, 0.0  ;;  %v1197_v17 = vadd.f32 %v1169_v9, %v1864_v50 }
 0x207   : > { %v1144_v1 = vmul.f32 %v1136_v60, %v1834_v40  ;;  %v1202_v31 = vmax.f32 %v1194_v23, %v1196_v20 }
 0x208   : > { %v1145_v5 = vmul.f32 %v1137_v0, %v1834_v40  ;;  %v1181_v40 = vadd.f32 %v1180_v34, %v1179_v3  ;;  %v1203_v26 = vmax.f32 %v1195_v43, %v1197_v17 }
 0x209   : > { %v1182_v6 = vrot.slane %v1144_v1, 4  ;;  %v1204_v38 = vmax.f32 %v1202_v31, %v1198_v33 }
 0x20a   : > { %v1188_v29 = vrot.slane %v1145_v5, 4  ;;  %v1199_v30 = vadd.f32 %v1181_v40, %v1864_v50 }
 0x20b   : > { %v1183_v25 = vadd.f32 %v1182_v6, %v1144_v1 }
 0x20c   : > { %v1189_v13 = vadd.f32 %v1188_v29, %v1145_v5  ;;  %v1205_v37 = vmax.f32 %v1203_v26, %v1199_v30 }
 0x20d   : > { %v1184_v14 = vrot.slane %v1183_v25, 2 }
 0x20e   : > { %v1190_v18 = vrot.slane %v1189_v13, 2 }
 0x20f   : > { %v1185_v19 = vadd.f32 %v1184_v14, %v1183_v25 }
 0x210   : > { %v1191_v21 = vadd.f32 %v1190_v18, %v1189_v13 }
 0x211   : > { %v1186_v22 = vrot.slane %v1185_v19, 1 }
 0x212   : > { %v1192_v27 = vrot.slane %v1191_v21, 1 }
 0x213   : > { %v1187_v28 = vadd.f32 %v1186_v22, %v1185_v19 }
 0x214   : > { %v1193_v32 = vadd.f32 %v1192_v27, %v1191_v21 }
 0x215   : > { %v1200_v35 = vadd.f32 %v1187_v28, %v1864_v50 }
 0x216   : > { %v1201_v36 = vadd.f32 %v1193_v32, %v1864_v50 }
 0x217   : > { %v1206_v41 = vmax.f32 %v1204_v38, %v1200_v35 }
 0x218   : > { %v1207_v39 = vmax.f32 %v1205_v37, %v1201_v36 }
 0x21a   : > { %v1211_v42 = vrot.slane %v1207_v39, 7 }
 0x21c   : > { %v1212_v45 = vsel %vm802_vm4, %v1206_v41, %v1211_v42 }
 0x21d   : > { %v1214_v46 = vmax.f32 %v1208_v44, %v1212_v45 }
 0x21f   : > { %1215 = vst.msk [vmem:[%s1845_s12] sm:$0x3] %vm1841_vm3, %v1214_v46 }
 0x226   : > { %v1219_v12 = vld [vmem:[%s1845_s12] sm:$0x3] }
 0x227   : > { %v1399_v47 = vmul.f32 -1.442695, %v1219_v12 }
 0x229   : > { %1473 = vpow2.f32 %v1399_v47 }
 0x22f   : > { %v1474_v48 = vpop.eup %1473 }
 0x230   : > { %v1223_v51 = vadd.f32 1.0, %v1474_v48 }
 0x232   : > { %1475 = vrcp.f32 %v1223_v51  ;;  %v1235_v54 = vand.u32 2147483648, %v1223_v51  ;;  %v1233_v56 = vand.u32 2147483647, %v1223_v51  ;;  %vm1229_vm6 = vweird.f32 %v1223_v51 }
 0x234   : > { %v1236_v58 = vor.u32 1.1754944e-38, %v1235_v54  ;;  %vm1234_vm8 = vcmp.eq.f32.partialorder %v1233_v56, 8.507059e+37 }
 0x238   : > { %v1476_v50 = vpop.eup %1475 }
 0x239   : > { %v1225_v52 = vmul.f32 %v1476_v50, %v1223_v51  ;;  %vm1230_vm5 = vweird.f32 %v1476_v50 }
 0x23a   : > { %vm1231_vm7 = vmor %vm1229_vm6, %vm1230_vm5 }
 0x23b   : > { %v1226_v53 = vsub.f32 1.0, %v1225_v52 }
 0x23d   : > { %v1227_v55 = vmul.f32 %v1476_v50, %v1226_v53 }
 0x23f   : > { %v1228_v57 = vadd.f32 %v1476_v50, %v1227_v55 }
 0x241   : > { %v1232_v59 = vsel %vm1231_vm7, %v1476_v50, %v1228_v57 }
 0x242   : > { %v1237_v60 = vsel %vm1234_vm8, %v1236_v58, %v1232_v59 }
 0x243   : > { %1239 = vst.msk [vmem:[%s1845_s12] sm:$0x3] %vm1841_vm3, %v1237_v60 }
 0x244   : > { %1534 = shalt.err (!%p1531_p13)
}
 0x245   : > { %1408 = dma.vmem_to_hbm [thread:$0]  (%p1687_p9), %s1258_s23, 32, %s1260_s24, %s1241_s29  }
 0x246 PF: > { %s1271_s11 = sand.u32 1, %s1569_s26   ;;  %p1415_p0 = pnand %p1356_p12, %p1694_p11 }
 0x247   : > { %s1272_s12 = scalar_lea.sflag [#allocation5], %s1271_s11 }
 0x248   : > { %p1416_p1 = pneg %p1415_p0 }
 0x24a   : > { %1564 = dma.done.wait (%p1416_p1), %s1272_s12, 32  }
 0x24b   : > { %1566 = vsyncadd (%p1416_p1), %s1272_s12, 4294967264  ;;  %s25_s8 = sadd.s32 1, %s1589_s8   ;;  %s1993_s26 = smov %s1573_s27 }
 0x24c   : > { %p22_p2 = scmp.ge.s32.totalorder %s25_s8, 4   ;;  %s1994_s27 = smov %s1577_s28 }
 0x24d   : > { %s1995_s28 = smov %s1692_s16  ;;  %s1996_s29 = smov %s1585_s30 }
 0x24e   : > { %s1997_s30 = smov %s1999_s10  ;;  %24 = sbr.rel (!%p22_p2) target bundleno = 9 (0x9), region = 103 }
 0x253   :  { %1278 = vsyncpa [#allocation4], 1 }
 0x254   :  { %1280 = vsyncpa [#allocation4 + $0x1], 1 }
 0x255   :  { %1281 = vsyncpa [#allocation5], 1 }
 0x256   :  { %1283 = vsyncpa [#allocation5 + $0x1], 1 }

</bundles_post_ra>
